<compile_context>
chip_gen: v7x
topology: tpu7x:2x2x1
jax: 0.10.0
libtpu: 0.0.40
codegen_flags: <defaults>
</compile_context>

<pallas_src>
import functools

import jax
import jax.numpy as jnp
from jax import lax
from jax.experimental import pallas as pl
from jax.experimental.pallas import tpu as pltpu


LATENT_DIMS = 32
N_ACTIONS = 8

L1_SHAPE = (128, LATENT_DIMS)
B1_SHAPE = (128,)
L2_SHAPE = (256, 128)
B2_SHAPE = (256,)
L3_SHAPE = (N_ACTIONS, 256)
B3_SHAPE = (N_ACTIONS,)

# F.linear(x, W, b) == x @ W.T + b  -> contract last dims of both operands.
_DN_LINEAR = (((1,), (1,)), ((), ()))

_FLOPS_PER_SAMPLE = 2 * (L1_SHAPE[0] * L1_SHAPE[1]
                         + L2_SHAPE[0] * L2_SHAPE[1]
                         + L3_SHAPE[0] * L3_SHAPE[1])

_SHARED_BLOCK_B = 4096           # rows of x per step in the shared-weights path
_VMEM_BLOCK_BUDGET = 12 << 20    # per-block bytes; 2x buffered stays <= ~24 MiB
_VMEM_LIMIT_BYTES = 40 << 20     # scoped VMEM limit (safe on v5e/v6e/v7x)


def total_params_count():
    return (L1_SHAPE[0] * L1_SHAPE[1] + B1_SHAPE[0]
            + L2_SHAPE[0] * L2_SHAPE[1] + B2_SHAPE[0]
            + L3_SHAPE[0] * L3_SHAPE[1] + B3_SHAPE[0])


def _round_up(n, m):
    return ((n + m - 1) // m) * m


def _split_hypernet(hypernet):
    """Slice flat parameter vector(s) into per-layer tensors (PyTorch layout)."""
    lead = hypernet.shape[:-1]
    pos = 0

    def take(n):
        nonlocal pos
        out = hypernet[..., pos:pos + n]
        pos += n
        return out

    w1 = take(L1_SHAPE[0] * L1_SHAPE[1]).reshape(*lead, *L1_SHAPE)
    b1 = take(B1_SHAPE[0])
    w2 = take(L2_SHAPE[0] * L2_SHAPE[1]).reshape(*lead, *L2_SHAPE)
    b2 = take(B2_SHAPE[0])
    w3 = take(L3_SHAPE[0] * L3_SHAPE[1]).reshape(*lead, *L3_SHAPE)
    b3 = take(B3_SHAPE[0])
    return w1, b1, w2, b2, w3, b3


def _nbytes(*arrays):
    return int(sum(a.size * a.dtype.itemsize for a in arrays))


def _compute_dtype(weight_dtype):
    # fp8 weight streams are upcast to bf16 for the dot (v7x MXU would take
    # fp8 natively, but bf16 is correct on every chip and the cast hides
    # under the weight DMA).  bf16 / f32 pass through unchanged.
    return jnp.bfloat16 if jnp.dtype(weight_dtype).itemsize < 2 else weight_dtype


# ---------------------------------------------------------------------------
# Kernel 1: per-sample weights (hypernet is 2-D).  One grid step = a block of
# `bs` samples.  Each layer is a single batched contraction over the block;
# compute hides under the (bandwidth-bound) weight DMA.
#   x_ref:  (bs, 1, L)          w1_ref: (bs, L, 128)     b1_ref: (bs, 1, 128)
#   w2_ref: (bs, 128, 256)      b2_ref: (bs, 1, 256)
#   w3_ref: (bs, A, 256)        b3_ref: (bs, 1, A)       out_ref: (bs, 1, A)
# ---------------------------------------------------------------------------
def _persample_kernel(x_ref, w1_ref, b1_ref, w2_ref, b2_ref, w3_ref, b3_ref,
                      out_ref):
    cdt = _compute_dtype(w1_ref.dtype)
    f32 = jnp.float32
    h = jnp.einsum("bql,blo->bqo", x_ref[...].astype(cdt),
                   w1_ref[...].astype(cdt), preferred_element_type=f32)
    h = jnp.maximum(h + b1_ref[...].astype(f32), 0.0)               # (bs, 1, 128)
    h = jnp.einsum("bqm,bmo->bqo", h.astype(cdt),
                   w2_ref[...].astype(cdt), preferred_element_type=f32)
    h = jnp.maximum(h + b2_ref[...].astype(f32), 0.0)               # (bs, 1, 256)
    h = jnp.einsum("bqm,bom->bqo", h.astype(cdt),
                   w3_ref[...].astype(cdt), preferred_element_type=f32)
    out_ref[...] = (h + b3_ref[...].astype(f32)).astype(out_ref.dtype)


def _auto_block_b(weight_itemsize):
    """Samples per block from a VMEM budget (weights dominate the bytes)."""
    weight_bytes = (L1_SHAPE[0] * L1_SHAPE[1] + L2_SHAPE[0] * L2_SHAPE[1]
                    + L3_SHAPE[0] * L3_SHAPE[1]) * weight_itemsize
    pad_bytes = 5 * 8 * 256 * 4       # padded x / bias / out rows per sample
    per_sample = weight_bytes + pad_bytes
    bs = max(8, (_VMEM_BLOCK_BUDGET // per_sample) // 8 * 8)
    return int(min(bs, 128))          # f32 -> 64, bf16 -> ~104


def _forward_per_sample(x, w1t, b1, w2t, b2, w3, b3, block_b):
    B = x.shape[0]
    L, A = LATENT_DIMS, N_ACTIONS

    if block_b is None:
        bs = _auto_block_b(jnp.dtype(w1t.dtype).itemsize)
    else:
        bs = max(1, int(block_b))
    if B > 8:
        # Keep >= 2 grid steps so both v7x TensorCores get work.
        bs = min(bs, _round_up(pl.cdiv(B, 2), 8))
    bs = min(bs, B)
    grid = (pl.cdiv(B, bs),)

    x3 = x[:, None, :]                 # (B, 1, L)
    b1_3 = b1[:, None, :]
    b2_3 = b2[:, None, :]
    b3_3 = b3[:, None, :]

    cost = pl.CostEstimate(
        flops=_FLOPS_PER_SAMPLE * B,
        transcendentals=0,
        bytes_accessed=_nbytes(x, w1t, b1, w2t, b2, w3, b3)
        + B * A * x.dtype.itemsize)

    grid_spec = pltpu.PrefetchScalarGridSpec(
        num_scalar_prefetch=0,
        grid=grid,
        in_specs=[
            pl.BlockSpec((bs, 1, L), lambda i: (i, 0, 0)),            # x
            pl.BlockSpec((bs, L, 128), lambda i: (i, 0, 0)),          # w1^T
            pl.BlockSpec((bs, 1, 128), lambda i: (i, 0, 0)),          # b1
            pl.BlockSpec((bs, 128, 256), lambda i: (i, 0, 0)),        # w2^T
            pl.BlockSpec((bs, 1, 256), lambda i: (i, 0, 0)),          # b2
            pl.BlockSpec((bs, A, 256), lambda i: (i, 0, 0)),          # w3
            pl.BlockSpec((bs, 1, A), lambda i: (i, 0, 0)),            # b3
        ],
        out_specs=pl.BlockSpec((bs, 1, A), lambda i: (i, 0, 0)),
    )

    out3 = pl.pallas_call(
        _persample_kernel,
        out_shape=jax.ShapeDtypeStruct((B, 1, A), x.dtype),
        grid_spec=grid_spec,
        compiler_params=pltpu.CompilerParams(
            dimension_semantics=("parallel",),
            vmem_limit_bytes=_VMEM_LIMIT_BYTES),
        cost_estimate=cost,
    )(x3, w1t, b1_3, w2t, b2_3, w3, b3_3)
    return out3[:, 0, :]


# ---------------------------------------------------------------------------
# Kernel 2: shared weights (hypernet is 1-D).  Weights use constant index_maps
# so the single copy stays resident in VMEM across the whole grid; each grid
# step runs three real matmuls on a large block of rows of x.
# ---------------------------------------------------------------------------
def _shared_kernel(x_ref, w1_ref, b1_ref, w2_ref, b2_ref, w3_ref, b3_ref,
                   out_ref):
    cdt = _compute_dtype(w1_ref.dtype)
    f32 = jnp.float32
    h = jnp.dot(x_ref[...].astype(cdt), w1_ref[...].astype(cdt),
                preferred_element_type=f32)
    h = jnp.maximum(h + b1_ref[...].astype(f32), 0.0)               # (bm, 128)
    h = jnp.dot(h.astype(cdt), w2_ref[...].astype(cdt),
                preferred_element_type=f32)
    h = jnp.maximum(h + b2_ref[...].astype(f32), 0.0)               # (bm, 256)
    h = lax.dot_general(h.astype(cdt), w3_ref[...].astype(cdt), _DN_LINEAR,
                        preferred_element_type=f32)
    out_ref[...] = (h + b3_ref[...].astype(f32)).astype(out_ref.dtype)


def _forward_shared(x, w1t, b1, w2t, b2, w3, b3):
    B = x.shape[0]
    L, A = LATENT_DIMS, N_ACTIONS

    bm = min(B, _SHARED_BLOCK_B)
    if B > 8:
        # >= 2 grid steps so both v7x TensorCores get work.
        bm = min(bm, _round_up(pl.cdiv(B, 2), 8))
    if bm < B:
        bm = max(8, (bm // 8) * 8)     # sublane-friendly block height
    grid = (pl.cdiv(B, bm),)

    b1_2 = b1.reshape(1, -1)
    b2_2 = b2.reshape(1, -1)
    b3_2 = b3.reshape(1, -1)

    cost = pl.CostEstimate(
        flops=_FLOPS_PER_SAMPLE * B,
        transcendentals=0,
        bytes_accessed=_nbytes(x, w1t, b1, w2t, b2, w3, b3)
        + B * A * x.dtype.itemsize)

    grid_spec = pltpu.PrefetchScalarGridSpec(
        num_scalar_prefetch=0,
        grid=grid,
        in_specs=[
            pl.BlockSpec((bm, L), lambda i: (i, 0)),                  # x
            pl.BlockSpec((L, 128), lambda i: (0, 0)),                 # w1^T (resident)
            pl.BlockSpec((1, 128), lambda i: (0, 0)),                 # b1
            pl.BlockSpec((128, 256), lambda i: (0, 0)),               # w2^T (resident)
            pl.BlockSpec((1, 256), lambda i: (0, 0)),                 # b2
            pl.BlockSpec((A, 256), lambda i: (0, 0)),                 # w3   (resident)
            pl.BlockSpec((1, A), lambda i: (0, 0)),                   # b3
        ],
        out_specs=pl.BlockSpec((bm, A), lambda i: (i, 0)),
    )

    return pl.pallas_call(
        _shared_kernel,
        out_shape=jax.ShapeDtypeStruct((B, A), x.dtype),
        grid_spec=grid_spec,
        compiler_params=pltpu.CompilerParams(
            dimension_semantics=("parallel",),
            vmem_limit_bytes=_VMEM_LIMIT_BYTES),
        cost_estimate=cost,
    )(x, w1t, b1_2, w2t, b2_2, w3, b3_2)


# ---------------------------------------------------------------------------
# Public entry point.
# ---------------------------------------------------------------------------
@functools.partial(jax.jit, static_argnames=("param_dtype", "block_b"))
def neural_network_forward(x, hypernet, *, param_dtype=jnp.bfloat16,
                           block_b=None):
    """Pallas equivalent of NeuralNetwork.forward(x, hypernet).

    param_dtype: dtype of the streamed weight matrices.  Defaults to bfloat16
                 (halves HBM traffic on the bandwidth-bound per-sample path;
                 this is a deliberate precision trade-off).  Pass
                 jnp.float32 for exact f32, or an fp8 dtype to stream at
                 1 byte/weight (weights are upcast to bf16 for the dot).
                 Accumulation is always float32.
    block_b:     optional override of samples per grid step in the
                 per-sample path (auto-derived from a VMEM budget if None).
    """
    if hypernet.shape[-1] != total_params_count():
        raise ValueError("hypernet has wrong number of parameters")

    shared = hypernet.ndim == 1
    pdt = x.dtype if param_dtype is None else jnp.dtype(param_dtype)

    # Single wrapper-side pass: slice + reshape + transpose + cast fuse into
    # one producer fusion per weight tensor (reads the f32 slice once, writes
    # the lane-dense, possibly narrower layout once).
    w1, b1, w2, b2, w3, b3 = _split_hypernet(hypernet)
    w1t = jnp.swapaxes(w1, -1, -2).astype(pdt)     # (..., L, 128)   lane-dense
    w2t = jnp.swapaxes(w2, -1, -2).astype(pdt)     # (..., 128, 256) lane-dense
    w3 = w3.astype(pdt)                            # (..., A, 256)   already dense
    b1 = b1.astype(jnp.float32)
    b2 = b2.astype(jnp.float32)
    b3 = b3.astype(jnp.float32)

    if shared:
        return _forward_shared(x, w1t, b1, w2t, b2, w3, b3)
    return _forward_per_sample(x, w1t, b1, w2t, b2, w3, b3, block_b)


# ---------------------------------------------------------------------------
# Pure-JAX reference mirroring the PyTorch module exactly.
# ---------------------------------------------------------------------------
def _reference_forward(x, hypernet):
    B = x.shape[0]
    if hypernet.ndim == 1:
        hypernet = jnp.broadcast_to(hypernet[None, :], (B, hypernet.shape[0]))
    w1, b1, w2, b2, w3, b3 = _split_hypernet(hypernet)
    h = jnp.maximum(jnp.einsum("bi,boi->bo", x, w1) + b1, 0.0)
    h = jnp.maximum(jnp.einsum("bi,boi->bo", h, w2) + b2, 0.0)
    return jnp.einsum("bi,boi->bo", h, w3) + b3


if __name__ == "__main__":
    key = jax.random.PRNGKey(0)
    kx, kh, kx2, kh2 = jax.random.split(key, 4)
    P = total_params_count()

    # Case 1: small batch, per-sample hypernet (2-D), exact f32 streaming.
    B1 = 2
    x1 = jax.random.normal(kx, (B1, LATENT_DIMS), dtype=jnp.float32)
    hyper1 = 0.05 * jax.random.normal(kh, (B1, P), dtype=jnp.float32)
    out1 = jax.block_until_ready(
        neural_network_forward(x1, hyper1, param_dtype=jnp.float32))
    ref1 = _reference_forward(x1, hyper1)
    assert out1.shape == (B1, N_ACTIONS)
    assert jnp.allclose(out1, ref1, atol=1e-4, rtol=1e-4), "per-sample f32 mismatch"

    # Case 2: shared hypernet (1-D) -> resident-weight matmul path, f32.
    hyper_shared = 0.05 * jax.random.normal(kh, (P,), dtype=jnp.float32)
    out2 = jax.block_until_ready(
        neural_network_forward(x1, hyper_shared, param_dtype=jnp.float32))
    ref2 = _reference_forward(x1, hyper_shared)
    assert jnp.allclose(out2, ref2, atol=1e-4, rtol=1e-4), "shared f32 mismatch"

    # Case 3: multi-block grid (24 samples, explicit 8-sample blocks), f32.
    B3 = 24
    x3 = jax.random.normal(kx2, (B3, LATENT_DIMS), dtype=jnp.float32)
    hyper3 = 0.05 * jax.random.normal(kh2, (B3, P), dtype=jnp.float32)
    out3 = jax.block_until_ready(
        neural_network_forward(x3, hyper3, param_dtype=jnp.float32, block_b=8))
    ref3 = _reference_forward(x3, hyper3)
    assert jnp.allclose(out3, ref3, atol=1e-4, rtol=1e-4), "blocked f32 mismatch"

    # Case 4: default bf16 weight streaming, auto block size (perf default).
    out4 = jax.block_until_ready(neural_network_forward(x3, hyper3))
    assert jnp.allclose(out4, ref3, atol=5e-2, rtol=5e-2), "bf16 per-sample mismatch"

    # Case 5: default bf16 on the shared (resident-weight) path, multi-block.
    out5 = jax.block_until_ready(neural_network_forward(x3, hyper_shared))
    ref5 = _reference_forward(x3, hyper_shared)
    assert jnp.allclose(out5, ref5, atol=5e-2, rtol=5e-2), "bf16 shared mismatch"

    print("KERNEL_OK")
</pallas_src>

<mosaic_0001>
module attributes {stable_mosaic.version = 11 : i64} {
  func.func @_persample_kernel(%arg0: i32, %arg1: memref<2x1x32xf32, #tpu.memory_space<vmem>>, %arg2: memref<2x32x128xf32, #tpu.memory_space<vmem>>, %arg3: memref<2x1x128xf32, #tpu.memory_space<vmem>>, %arg4: memref<2x128x256xf32, #tpu.memory_space<vmem>>, %arg5: memref<2x1x256xf32, #tpu.memory_space<vmem>>, %arg6: memref<2x8x256xf32, #tpu.memory_space<vmem>>, %arg7: memref<2x1x8xf32, #tpu.memory_space<vmem>>, %arg8: memref<2x1x8xf32, #tpu.memory_space<vmem>>) attributes {dimension_semantics = [#tpu.dimension_semantics<parallel>], iteration_bounds = array<i64: 1>, scalar_prefetch = 0 : i64, scratch_operands = 0 : i64, tpu.core_type = #tpu.core_type<tc>, window_params = [{transform_indices = @transform_0, window_bounds = array<i64: 2, 1, 32>}, {transform_indices = @transform_1, window_bounds = array<i64: 2, 32, 128>}, {transform_indices = @transform_2, window_bounds = array<i64: 2, 1, 128>}, {transform_indices = @transform_3, window_bounds = array<i64: 2, 128, 256>}, {transform_indices = @transform_4, window_bounds = array<i64: 2, 1, 256>}, {transform_indices = @transform_5, window_bounds = array<i64: 2, 8, 256>}, {transform_indices = @transform_6, window_bounds = array<i64: 2, 1, 8>}, {transform_indices = @transform_7, window_bounds = array<i64: 2, 1, 8>}]} {
    %c0 = arith.constant 0 : index
    %c0_0 = arith.constant 0 : index
    %c0_1 = arith.constant 0 : index
    %0 = vector.load %arg1[%c0, %c0_0, %c0_1] : memref<2x1x32xf32, #tpu.memory_space<vmem>>, vector<2x1x32xf32>
    %c0_2 = arith.constant 0 : index
    %c0_3 = arith.constant 0 : index
    %c0_4 = arith.constant 0 : index
    %1 = vector.load %arg2[%c0_2, %c0_3, %c0_4] : memref<2x32x128xf32, #tpu.memory_space<vmem>>, vector<2x32x128xf32>
    "tpu.trace_start"() <{level = 10 : i32, message = "bql,blo->bqo"}> : () -> ()
    %cst = arith.constant dense<0.000000e+00> : vector<2x1x128xf32>
    %2 = tpu.matmul %0, %1, %cst {dimension_numbers = #tpu.dot_dimension_numbers<[2], [1], [1], [2], [0, 0, 0, 1, 1, 2], [0], [0]>} : vector<2x1x32xf32>, vector<2x32x128xf32>, vector<2x1x128xf32> -> vector<2x1x128xf32>
    "tpu.trace_stop"() : () -> ()
    %c0_5 = arith.constant 0 : index
    %c0_6 = arith.constant 0 : index
    %c0_7 = arith.constant 0 : index
    %3 = vector.load %arg3[%c0_5, %c0_6, %c0_7] : memref<2x1x128xf32, #tpu.memory_space<vmem>>, vector<2x1x128xf32>
    %4 = arith.addf %2, %3 : vector<2x1x128xf32>
    %cst_8 = arith.constant 0.000000e+00 : f32
    %5 = vector.broadcast %cst_8 : f32 to vector<2x1x128xf32>
    %6 = arith.maximumf %4, %5 : vector<2x1x128xf32>
    %c0_9 = arith.constant 0 : index
    %c0_10 = arith.constant 0 : index
    %c0_11 = arith.constant 0 : index
    %7 = vector.load %arg4[%c0_9, %c0_10, %c0_11] : memref<2x128x256xf32, #tpu.memory_space<vmem>>, vector<2x128x256xf32>
    "tpu.trace_start"() <{level = 10 : i32, message = "bqm,bmo->bqo"}> : () -> ()
    %cst_12 = arith.constant dense<0.000000e+00> : vector<2x1x256xf32>
    %8 = tpu.matmul %6, %7, %cst_12 {dimension_numbers = #tpu.dot_dimension_numbers<[2], [1], [1], [2], [0, 0, 0, 1, 1, 2], [0], [0]>} : vector<2x1x128xf32>, vector<2x128x256xf32>, vector<2x1x256xf32> -> vector<2x1x256xf32>
    "tpu.trace_stop"() : () -> ()
    %c0_13 = arith.constant 0 : index
    %c0_14 = arith.constant 0 : index
    %c0_15 = arith.constant 0 : index
    %9 = vector.load %arg5[%c0_13, %c0_14, %c0_15] : memref<2x1x256xf32, #tpu.memory_space<vmem>>, vector<2x1x256xf32>
    %10 = arith.addf %8, %9 : vector<2x1x256xf32>
    %cst_16 = arith.constant 0.000000e+00 : f32
    %11 = vector.broadcast %cst_16 : f32 to vector<2x1x256xf32>
    %12 = arith.maximumf %10, %11 : vector<2x1x256xf32>
    %c0_17 = arith.constant 0 : index
    %c0_18 = arith.constant 0 : index
    %c0_19 = arith.constant 0 : index
    %13 = vector.load %arg6[%c0_17, %c0_18, %c0_19] : memref<2x8x256xf32, #tpu.memory_space<vmem>>, vector<2x8x256xf32>
    "tpu.trace_start"() <{level = 10 : i32, message = "bqm,bom->bqo"}> : () -> ()
    %cst_20 = arith.constant dense<0.000000e+00> : vector<2x1x8xf32>
    %14 = tpu.matmul %12, %13, %cst_20 {dimension_numbers = #tpu.dot_dimension_numbers<[2], [2], [1], [1], [0, 0, 0, 1, 1, 1], [0], [0]>} : vector<2x1x256xf32>, vector<2x8x256xf32>, vector<2x1x8xf32> -> vector<2x1x8xf32>
    "tpu.trace_stop"() : () -> ()
    %c0_21 = arith.constant 0 : index
    %c0_22 = arith.constant 0 : index
    %c0_23 = arith.constant 0 : index
    %15 = vector.load %arg7[%c0_21, %c0_22, %c0_23] : memref<2x1x8xf32, #tpu.memory_space<vmem>>, vector<2x1x8xf32>
    %16 = arith.addf %14, %15 : vector<2x1x8xf32>
    %c0_24 = arith.constant 0 : index
    %c0_25 = arith.constant 0 : index
    %c0_26 = arith.constant 0 : index
    %17 = vector.load %arg8[%c0_24, %c0_25, %c0_26] : memref<2x1x8xf32, #tpu.memory_space<vmem>>, vector<2x1x8xf32>
    tpu.vector_store %arg8[%c0_24, %c0_25, %c0_26], %16 {strides = array<i32>} : memref<2x1x8xf32, #tpu.memory_space<vmem>>, vector<2x1x8xf32>,
    return
  }
  func.func @transform_0(%arg0: i32) -> (i32, i32, i32) {
    %c0_i32 = arith.constant 0 : i32
    %c0_i32_0 = arith.constant 0 : i32
    %c0_i32_1 = arith.constant 0 : i32
    return %arg0, %c0_i32, %c0_i32_0 : i32, i32, i32
  }
  func.func @transform_1(%arg0: i32) -> (i32, i32, i32) {
    %c0_i32 = arith.constant 0 : i32
    %c0_i32_0 = arith.constant 0 : i32
    %c0_i32_1 = arith.constant 0 : i32
    return %arg0, %c0_i32, %c0_i32_0 : i32, i32, i32
  }
  func.func @transform_2(%arg0: i32) -> (i32, i32, i32) {
    %c0_i32 = arith.constant 0 : i32
    %c0_i32_0 = arith.constant 0 : i32
    %c0_i32_1 = arith.constant 0 : i32
    return %arg0, %c0_i32, %c0_i32_0 : i32, i32, i32
  }
  func.func @transform_3(%arg0: i32) -> (i32, i32, i32) {
    %c0_i32 = arith.constant 0 : i32
    %c0_i32_0 = arith.constant 0 : i32
    %c0_i32_1 = arith.constant 0 : i32
    return %arg0, %c0_i32, %c0_i32_0 : i32, i32, i32
  }
  func.func @transform_4(%arg0: i32) -> (i32, i32, i32) {
    %c0_i32 = arith.constant 0 : i32
    %c0_i32_0 = arith.constant 0 : i32
    %c0_i32_1 = arith.constant 0 : i32
    return %arg0, %c0_i32, %c0_i32_0 : i32, i32, i32
  }
  func.func @transform_5(%arg0: i32) -> (i32, i32, i32) {
    %c0_i32 = arith.constant 0 : i32
    %c0_i32_0 = arith.constant 0 : i32
    %c0_i32_1 = arith.constant 0 : i32
    return %arg0, %c0_i32, %c0_i32_0 : i32, i32, i32
  }
  func.func @transform_6(%arg0: i32) -> (i32, i32, i32) {
    %c0_i32 = arith.constant 0 : i32
    %c0_i32_0 = arith.constant 0 : i32
    %c0_i32_1 = arith.constant 0 : i32
    return %arg0, %c0_i32, %c0_i32_0 : i32, i32, i32
  }
  func.func @transform_7(%arg0: i32) -> (i32, i32, i32) {
    %c0_i32 = arith.constant 0 : i32
    %c0_i32_0 = arith.constant 0 : i32
    %c0_i32_1 = arith.constant 0 : i32
    return %arg0, %c0_i32, %c0_i32_0 : i32, i32, i32
  }
}

</mosaic_0001>

<bundles_post_ra>
// kernel: neural_network_forward.1
= control target key start
LH: loop header
LB: loop body
LE: loop exit
PB: predicated region body
PF: predicated region fallthrough
CT: control target
= control target key end

     0   :  { %v727_v3 = vmov 0.0|0.0   ;;  %vm728_vm0 = vmmov 0   ;;  %v729_v11 = vmov 0.0   ;;  %vm39_vm1 = vcmask 261120   ;;  %s1039_s0 = inlined_call_operand.vmem [shape: f32[2,1,32], index: 0, kind: input, shape index: {}]   ;;  %s1040_s1 = inlined_call_operand.vmem [shape: f32[2,32,128], index: 1, kind: input, shape index: {}]   ;;  %s1041_s2 = inlined_call_operand.vmem [shape: f32[2,1,128], index: 2, kind: input, shape index: {}]   ;;  %s1042_s3 = inlined_call_operand.vmem [shape: f32[2,128,256], index: 3, kind: input, shape index: {}]   ;;  %s1043_s4 = inlined_call_operand.vmem [shape: f32[2,1,256], index: 4, kind: input, shape index: {}]   ;;  %s1044_s5 = inlined_call_operand.vmem [shape: f32[2,8,256], index: 5, kind: input, shape index: {}]   ;;  %s1045_s6 = inlined_call_operand.vmem [shape: f32[2,1,8], index: 6, kind: input, shape index: {}]   ;;  %s1046_s7 = inlined_call_operand.hbm [shape: f32[2,1,8], index: 7, kind: output, shape index: {}]  }
   0x1   :  { %v29_v0 = vld [vmem:[%s1040_s1] sm:$0xff]  ;;  %v30_v1 = vld [vmem:[%s1040_s1 + $0x8] sm:$0xff]  ;;  %621 = vmatprep.subr.bf16.mxu0 %v727_v3  ;;  %627 = vmatprep.subr.bf16.mxu1 %v727_v3  ;;  %v31_v6 = vld [vmem:[%s1040_s1 + $0x10] sm:$0xff] }
   0x2   :  { %v33_v2 = vld [vmem:[%s1040_s1 + $0x20] sm:$0xff]  ;;  %v622_v4 = vpack.c.bf16 %v30_v1, %v29_v0  ;;  %v34_v5 = vld [vmem:[%s1040_s1 + $0x28] sm:$0xff]  ;;  %v32_v7 = vld [vmem:[%s1040_s1 + $0x18] sm:$0xff]  ;;  %607 = vmatprep.mubr.msk.f32.mxu0 %vm728_vm0, %v729_v11  ;;  %618 = vmatprep.mubr.msk.f32.mxu1 %vm728_vm0, %v729_v11 }
   0x3   :  { %v628_v8 = vpack.c.bf16 %v34_v5, %v33_v2  ;;  %v35_v9 = vld [vmem:[%s1040_s1 + $0x30] sm:$0xff]  ;;  %v36_v10 = vld [vmem:[%s1040_s1 + $0x38] sm:$0xff]  ;;  %v625_v12 = vpack.c.bf16 %v32_v7, %v31_v6  ;;  %v189_v13 = vld [vmem:[%s1042_s3 + $0x8] sm:$0xff] }
   0x4   :  { %623 = vmatpush3.bf16.msra.mxu0 %v622_v4  ;;  %v191_v14 = vld [vmem:[%s1042_s3 + $0x18] sm:$0xff]  ;;  %v631_v15 = vpack.c.bf16 %v36_v10, %v35_v9  ;;  %v221_v17 = vld [vmem:[%s1042_s3 + $0x108] sm:$0xff]  ;;  %v188_v19 = vld [vmem:[%s1042_s3] sm:$0xff] }
   0x5   :  { %629 = vmatpush3.bf16.msra.mxu1 %v628_v8  ;;  %624 = vmatprep.subr.bf16.mxu0 %v727_v3  ;;  %v633_v16 = vpack.c.bf16 %v191_v14, %v189_v13  ;;  %v223_v18 = vld [vmem:[%s1042_s3 + $0x118] sm:$0xff]  ;;  %v190_v21 = vld [vmem:[%s1042_s3 + $0x10] sm:$0xff]  ;;  %v220_v22 = vld [vmem:[%s1042_s3 + $0x100] sm:$0xff] }
   0x6   :  { %630 = vmatprep.subr.bf16.mxu1 %v727_v3  ;;  %v665_v20 = vpack.c.bf16 %v223_v18, %v221_v17  ;;  %v222_v23 = vld [vmem:[%s1042_s3 + $0x110] sm:$0xff]  ;;  %v193_v24 = vld [vmem:[%s1042_s3 + $0x28] sm:$0xff]  ;;  %v195_v25 = vld [vmem:[%s1042_s3 + $0x38] sm:$0xff]  ;;  %v635_v29 = vpack.c.bf16 %v190_v21, %v188_v19 }
   0x7   :  { %v225_v26 = vld [vmem:[%s1042_s3 + $0x128] sm:$0xff]  ;;  %v27_v27 = vld [vmem:[%s1039_s0] sm:$0x1]  ;;  %v28_v28 = vld [vmem:[%s1039_s0 + $0x1] sm:$0x1]  ;;  %v667_v31 = vpack.c.bf16 %v222_v23, %v220_v22  ;;  %v637_v32 = vpack.c.bf16 %v195_v25, %v193_v24 }
   0x8   :  { %626 = vmatpush3.bf16.msra.mxu0 %v625_v12  ;;  %v227_v30 = vld [vmem:[%s1042_s3 + $0x138] sm:$0xff]  ;;  %v192_v33 = vld [vmem:[%s1042_s3 + $0x20] sm:$0xff]  ;;  %v194_v34 = vld [vmem:[%s1042_s3 + $0x30] sm:$0xff] }
   0x9   :  { %632 = vmatpush3.bf16.msra.mxu1 %v631_v15  ;;  %634 = vmatprep.subr.bf16.mxu0 %v633_v16  ;;  %v224_v35 = vld [vmem:[%s1042_s3 + $0x120] sm:$0xff]  ;;  %v669_v36 = vpack.c.bf16 %v227_v30, %v225_v26  ;;  %v226_v37 = vld [vmem:[%s1042_s3 + $0x130] sm:$0xff]  ;;  %v197_v38 = vld [vmem:[%s1042_s3 + $0x48] sm:$0xff]  ;;  %v639_v42 = vpack.c.bf16 %v194_v34, %v192_v33 }
   0xa   :  { %666 = vmatprep.subr.bf16.mxu1 %v665_v20  ;;  %v199_v39 = vld [vmem:[%s1042_s3 + $0x58] sm:$0xff]  ;;  %v229_v40 = vld [vmem:[%s1042_s3 + $0x148] sm:$0xff]  ;;  %v671_v43 = vpack.c.bf16 %v226_v37, %v224_v35  ;;  %v196_v45 = vld [vmem:[%s1042_s3 + $0x40] sm:$0xff] }
   0xb   :  { %608 = vmatmul.mubr.msk.f32.vlgmr.msra.gmra.mrb[0].mxu0 %vm39_vm1, %v27_v27  ;;  %v231_v41 = vld [vmem:[%s1042_s3 + $0x158] sm:$0xff]  ;;  %v641_v44 = vpack.c.bf16 %v199_v39, %v197_v38  ;;  %v198_v46 = vld [vmem:[%s1042_s3 + $0x50] sm:$0xff]  ;;  %v228_v47 = vld [vmem:[%s1042_s3 + $0x140] sm:$0xff] }
   0xc   :  { %619 = vmatmul.mubr.msk.f32.vlgmr.msra.gmra.mrb[0].mxu1 %vm39_vm1, %v28_v28  ;;  %636 = vmatpush1.bf16.msra.mxu0 %v635_v29  ;;  %v673_v48 = vpack.c.bf16 %v231_v41, %v229_v40  ;;  %v230_v49 = vld [vmem:[%s1042_s3 + $0x150] sm:$0xff]  ;;  %v201_v50 = vld [vmem:[%s1042_s3 + $0x68] sm:$0xff]  ;;  %v203_v51 = vld [vmem:[%s1042_s3 + $0x78] sm:$0xff]  ;;  %v643_v54 = vpack.c.bf16 %v198_v46, %v196_v45 }
   0xd   :  { %668 = vmatpush1.bf16.msra.mxu1 %v667_v31  ;;  %638 = vmatprep.subr.bf16.mxu0 %v637_v32  ;;  %v233_v52 = vld [vmem:[%s1042_s3 + $0x168] sm:$0xff]  ;;  %v235_v53 = vld [vmem:[%s1042_s3 + $0x178] sm:$0xff]  ;;  %v675_v55 = vpack.c.bf16 %v230_v49, %v228_v47  ;;  %v645_v56 = vpack.c.bf16 %v203_v51, %v201_v50  ;;  %v200_v57 = vld [vmem:[%s1042_s3 + $0x60] sm:$0xff] }
   0xe   :  { %670 = vmatprep.subr.bf16.mxu1 %v669_v36  ;;  %329 = vmatprep.mubr.f32.mxu0 %v729_v11  ;;  %v202_v58 = vld [vmem:[%s1042_s3 + $0x70] sm:$0xff]  ;;  %v232_v59 = vld [vmem:[%s1042_s3 + $0x160] sm:$0xff]  ;;  %v677_v60 = vpack.c.bf16 %v235_v53, %v233_v52  ;;  %v205_v62 = vld [vmem:[%s1042_s3 + $0x88] sm:$0xff] }
   0xf   :  { %411 = vmatprep.mubr.f32.mxu1 %v729_v11  ;;  %v234_v61 = vld [vmem:[%s1042_s3 + $0x170] sm:$0xff]  ;;  %v207_v63 = vld [vmem:[%s1042_s3 + $0x98] sm:$0xff]  ;;  %v237_v0 = vld [vmem:[%s1042_s3 + $0x188] sm:$0xff]  ;;  %v647_v2 = vpack.c.bf16 %v202_v58, %v200_v57 }
  0x10   :  { %640 = vmatpush1.bf16.msra.mxu0 %v639_v42  ;;  %v239_v1 = vld [vmem:[%s1042_s3 + $0x198] sm:$0xff]  ;;  %v679_v3 = vpack.c.bf16 %v234_v61, %v232_v59  ;;  %v649_v4 = vpack.c.bf16 %v207_v63, %v205_v62  ;;  %v204_v5 = vld [vmem:[%s1042_s3 + $0x80] sm:$0xff]  ;;  %v206_v6 = vld [vmem:[%s1042_s3 + $0x90] sm:$0xff] }
  0x11   :  { %672 = vmatpush1.bf16.msra.mxu1 %v671_v43  ;;  %642 = vmatprep.subr.bf16.mxu0 %v641_v44  ;;  %v236_v7 = vld [vmem:[%s1042_s3 + $0x180] sm:$0xff]  ;;  %v681_v8 = vpack.c.bf16 %v239_v1, %v237_v0  ;;  %v238_v9 = vld [vmem:[%s1042_s3 + $0x190] sm:$0xff]  ;;  %v209_v10 = vld [vmem:[%s1042_s3 + $0xa8] sm:$0xff] }
  0x12   :  { %674 = vmatprep.subr.bf16.mxu1 %v673_v48  ;;  %v211_v11 = vld [vmem:[%s1042_s3 + $0xb8] sm:$0xff]  ;;  %v241_v12 = vld [vmem:[%s1042_s3 + $0x1a8] sm:$0xff] }
  0x13   :  { %v243_v13 = vld [vmem:[%s1042_s3 + $0x1b8] sm:$0xff] }
  0x14   :  { %644 = vmatpush1.bf16.msra.mxu0 %v643_v54 }
  0x15   :  { %676 = vmatpush1.bf16.msra.mxu1 %v675_v55  ;;  %646 = vmatprep.subr.bf16.mxu0 %v645_v56 }
  0x16   :  { %678 = vmatprep.subr.bf16.mxu1 %v677_v60 }
  0x17   :  { %12 = vsyncpa [#allocation3], 0  ;;  %v651_v14 = vpack.c.bf16 %v206_v6, %v204_v5  ;;  %v683_v15 = vpack.c.bf16 %v238_v9, %v236_v7  ;;  %v653_v16 = vpack.c.bf16 %v211_v11, %v209_v10  ;;  %v208_v17 = vld [vmem:[%s1042_s3 + $0xa0] sm:$0xff]  ;;  %v210_v18 = vld [vmem:[%s1042_s3 + $0xb0] sm:$0xff]  ;;  %v685_v20 = vpack.c.bf16 %v243_v13, %v241_v12  ;;  %s730_s14 = smov [#allocation2]  }
  0x18   :  { %648 = vmatpush1.bf16.msra.mxu0 %v647_v2  ;;  %v240_v19 = vld [vmem:[%s1042_s3 + $0x1a0] sm:$0xff]  ;;  %v242_v21 = vld [vmem:[%s1042_s3 + $0x1b0] sm:$0xff]  ;;  %v213_v22 = vld [vmem:[%s1042_s3 + $0xc8] sm:$0xff]  ;;  %v655_v26 = vpack.c.bf16 %v210_v18, %v208_v17  ;;  %v255_v62 = vlaneseq  ;;  %s576_s15 = sshll.u32 %s730_s14, 4  ;;  %vm568_vm2 = vcmask 57344   ;;  %s577_s15 = int_to_ptr.vmem [resolvable:$true] %s576_s15 }
  0x19   :  { %680 = vmatpush1.bf16.msra.mxu1 %v679_v3  ;;  %650 = vmatprep.subr.bf16.mxu0 %v649_v4  ;;  %v215_v23 = vld [vmem:[%s1042_s3 + $0xd8] sm:$0xff]  ;;  %v245_v24 = vld [vmem:[%s1042_s3 + $0x1c8] sm:$0xff]  ;;  %v687_v27 = vpack.c.bf16 %v242_v21, %v240_v19  ;;  %v212_v29 = vld [vmem:[%s1042_s3 + $0xc0] sm:$0xff]  ;;  %s703_s18 = scalar_lea.vmem %s577_s15, 32  ;;  %p708_p1 = scmp.lt.s32.totalorder %s577_s15, %s577_s15 }
  0x1a   :  { %682 = vmatprep.subr.bf16.mxu1 %v681_v8  ;;  %v247_v25 = vld [vmem:[%s1042_s3 + $0x1d8] sm:$0xff]  ;;  %v657_v28 = vpack.c.bf16 %v215_v23, %v213_v22  ;;  %v214_v30 = vld [vmem:[%s1042_s3 + $0xd0] sm:$0xff]  ;;  %v244_v32 = vld [vmem:[%s1042_s3 + $0x1c0] sm:$0xff]  ;;  %v256_v63 = vshrl.u32 %v255_v62, 7  ;;  %p704_p0 = scmp.ne.s32.totalorder %s577_s15, %s703_s18  ;;  %p709_p2 = scmp.lt.s32.totalorder %s703_s18, %s703_s18 }
  0x1b   :  { %v689_v31 = vpack.c.bf16 %v247_v25, %v245_v24  ;;  %v246_v33 = vld [vmem:[%s1042_s3 + $0x1d0] sm:$0xff]  ;;  %v659_v34 = vpack.c.bf16 %v214_v30, %v212_v29  ;;  %v217_v36 = vld [vmem:[%s1042_s3 + $0xe8] sm:$0xff]  ;;  %v219_v37 = vld [vmem:[%s1042_s3 + $0xf8] sm:$0xff] }
  0x1c   :  { %652 = vmatpush1.bf16.msra.mxu0 %v651_v14  ;;  %v691_v35 = vpack.c.bf16 %v246_v33, %v244_v32  ;;  %v249_v38 = vld [vmem:[%s1042_s3 + $0x1e8] sm:$0xff]  ;;  %v661_v39 = vpack.c.bf16 %v219_v37, %v217_v36  ;;  %v251_v40 = vld [vmem:[%s1042_s3 + $0x1f8] sm:$0xff]  ;;  %v216_v41 = vld [vmem:[%s1042_s3 + $0xe0] sm:$0xff]  ;;  %v257_v0 = vsub.s32 0, %v256_v63  ;;  %v261_v2 = vsub.s32 1, %v256_v63  ;;  %p710_p3 = por %p709_p2, %p708_p1 }
  0x1d   :  { %684 = vmatpush1.bf16.msra.mxu1 %v683_v15  ;;  %654 = vmatprep.subr.bf16.mxu0 %v653_v16  ;;  %v218_v42 = vld [vmem:[%s1042_s3 + $0xf0] sm:$0xff]  ;;  %v693_v43 = vpack.c.bf16 %v251_v40, %v249_v38  ;;  %v248_v45 = vld [vmem:[%s1042_s3 + $0x1e0] sm:$0xff]  ;;  %v423_v58 = vld [vmem:[%s1044_s5 + $0x8] sm:$0xff] }
  0x1e   :  { %686 = vmatprep.subr.bf16.mxu1 %v685_v20  ;;  %v663_v44 = vpack.c.bf16 %v218_v42, %v216_v41  ;;  %v250_v46 = vld [vmem:[%s1042_s3 + $0x1f0] sm:$0xff]  ;;  %v37_v48 = vld [vmem:[%s1041_s2] sm:$0x1]  ;;  %v38_v49 = vld [vmem:[%s1041_s2 + $0x1] sm:$0x1]  ;;  %p711_p4 = pnand %p710_p3, %p704_p0 }
  0x1f   :  { %v695_v47 = vpack.c.bf16 %v250_v46, %v248_v45  ;;  %v425_v59 = vld [vmem:[%s1044_s5 + $0x18] sm:$0xff]  ;;  %v422_v60 = vld [vmem:[%s1044_s5] sm:$0xff]  ;;  %v424_v61 = vld [vmem:[%s1044_s5 + $0x10] sm:$0xff] }
  0x20   :  { %656 = vmatpush1.bf16.msra.mxu0 %v655_v26  ;;  %v252_v1 = vld [vmem:[%s1043_s4] sm:$0x3]  ;;  %v253_v3 = vld [vmem:[%s1043_s4 + $0x2] sm:$0x3] }
  0x21   :  { %688 = vmatpush1.bf16.msra.mxu1 %v687_v27  ;;  %658 = vmatprep.subr.bf16.mxu0 %v657_v28  ;;  %v258_v4 = vrot.slane %v252_v1, %v257_v0  ;;  %v340_v5 = vrot.slane %v253_v3, %v257_v0  ;;  %v262_v6 = vrot.slane %v252_v1, %v261_v2  ;;  %v426_v20 = vld [vmem:[%s1045_s6] sm:$0x1]  ;;  %v427_v21 = vld [vmem:[%s1045_s6 + $0x1] sm:$0x1] }
  0x22   :  { %690 = vmatprep.subr.bf16.mxu1 %v689_v31  ;;  %v344_v7 = vrot.slane %v253_v3, %v261_v2 }
  0x24   :  { %660 = vmatpush1.bf16.msra.mxu0 %v659_v34 }
  0x25   :  { %692 = vmatpush1.bf16.msra.mxu1 %v691_v35  ;;  %662 = vmatprep.subr.bf16.mxu0 %v661_v39 }
  0x26   :  { %694 = vmatprep.subr.bf16.mxu1 %v693_v43 }
  0x28   :  { %664 = vmatpush1.bf16.msra.mxu0 %v663_v44 }
  0x29   :  { %696 = vmatpush1.bf16.msra.mxu1 %v695_v47  ;;  %428 = vmatprep.subr.mxu0 %v423_v58 }
  0x2a   :  { %498 = vmatprep.subr.mxu1 %v425_v59 }
  0xde   :  { %v109_v50 = vpop.f32.mrb[0].mxu0 }
  0xdf   :  { %v110_v51 = vadd.f32 %v109_v50, %v37_v48  ;;  %v182_v52 = vpop.f32.mrb[0].mxu1  ;;  %v609_v53 = vpop.f32.mrb[1].mxu0 }
  0xe0   :  { %v183_v54 = vadd.f32 %v182_v52, %v38_v49  ;;  %v620_v55 = vpop.f32.mrb[1].mxu1 }
  0xe1   :  { %v186_v56 = vmax.f32 %v110_v51, 0.0 }
  0xe2   :  { %v187_v57 = vmax.f32 %v183_v54, 0.0 }
  0xe3   :  { %330 = vmatmul.mubr.f32.vlgmr.msra.gmra.mrb[2].mxu0 %v186_v56 }
  0xe4   :  { %412 = vmatmul.mubr.f32.vlgmr.msra.gmra.mrb[2].mxu1 %v187_v57  ;;  %429 = vmatpush1.xpose.msra.mxu0 %v422_v60 }
  0xe5   :  { %499 = vmatpush1.xpose.msra.mxu1 %v424_v61 }
 0x1b6   :  { %v331_v8 = vpop.f32.mrb[2].mxu0 }
 0x1b7   :  { %v332_v9 = vadd.f32 %v331_v8, %v258_v4  ;;  %v413_v10 = vpop.f32.mrb[2].mxu1  ;;  %v333_v11 = vpop.f32.mrb[3].mxu0 }
 0x1b8   :  { %v414_v12 = vadd.f32 %v413_v10, %v340_v5  ;;  %v334_v13 = vadd.f32 %v333_v11, %v262_v6  ;;  %v415_v14 = vpop.f32.mrb[3].mxu1 }
 0x1b9   :  { %v416_v15 = vadd.f32 %v415_v14, %v344_v7  ;;  %v418_v17 = vmax.f32 %v332_v9, 0.0 }
 0x1ba   :  { %v419_v16 = vmax.f32 %v334_v13, 0.0  ;;  %v420_v19 = vmax.f32 %v414_v12, 0.0 }
 0x1bb   :  { %v421_v18 = vmax.f32 %v416_v15, 0.0 }
 0x1bc   :  { %492 = vmatprep.mubr.f32.mxu0 %v419_v16 }
 0x1bd   :  { %562 = vmatprep.mubr.f32.mxu1 %v421_v18  ;;  %493 = vmatmul.mubr.f32.vlgmr.msra.gmra.mrb[4].mxu0 %v418_v17 }
 0x1be   :  { %563 = vmatmul.mubr.f32.vlgmr.msra.gmra.mrb[4].mxu1 %v420_v19 }
 0x290   :  { %v494_v22 = vpop.f32.mrb[4].mxu0 }
 0x291   :  { %v495_v23 = vadd.f32 %v494_v22, %v426_v20  ;;  %v564_v24 = vpop.f32.mrb[4].mxu1  ;;  %v496_v25 = vpop.f32.mrb[5].mxu0 }
 0x292   :  { %v565_v26 = vadd.f32 %v564_v24, %v427_v21  ;;  %v566_v27 = vpop.f32.mrb[5].mxu1 }
 0x293   :  { %569 = vst.msk [vmem:[#allocation2] sm:$0x1] %vm568_vm2, %v495_v23 }
 0x294   :  { %570 = vst.msk [vmem:[#allocation2 + $0x1] sm:$0x1] %vm568_vm2, %v565_v26 }
 0x295   :  { %714 = shalt.err (!%p711_p4)
}
 0x296   :  { %s715_s6 = scalar_lea.hbm %s1046_s7, 32 }
 0x297   :  { %p716_p5 = scmp.ne.s32.totalorder %s1046_s7, %s715_s6  ;;  %p719_p6 = scmp.lt.u32.totalorder %s715_s6, %s1046_s7 }
 0x299   :  { %p721_p7 = pnand %p719_p6, %p716_p5 }
 0x29b   :  { %724 = shalt.err (!%p721_p7)
}
 0x29c   :  { %s731_s24 = smov 16   ;;  %s732_s25 = smov 1  }
 0x29d   :  { %582 = dma.vmem_to_hbm [thread:$0]  %s577_s15, 32, %s1046_s7, [#allocation3], %s731_s24, %s731_s24, %s732_s25  }
 0x29e   :  { %725 = dma.done.wait [#allocation3], 32  }
 0x29f   :  { %726 = vsyncadd [#allocation3], 4294967264 }
 0x2a0   :  { %586 = vsyncpa [#allocation3], 1 }

</bundles_post_ra>
